<compile_context>
chip_gen: v7x
topology: tpu7x:2x2x1
jax: 0.10.0
libtpu: 0.0.40
codegen_flags: <defaults>
</compile_context>

<pallas_src>
import jax
import jax.numpy as jnp
from jax.experimental import pallas as pl
from jax.experimental.pallas import tpu as pltpu

MAX_ARITY = 6


def _round_up(x, m):
    return ((x + m - 1) // m) * m


# ---------------------------------------------------------------------------
# Pallas kernel:
#   x = r * e1 * lshift(e2, D/6) * ... * lshift(e6, 5D/6)
#   out[0, 0, row] = sum_d x[row, d]          (lane-dense row sums)
# ---------------------------------------------------------------------------
def _hsimple_kernel(r_ref, e1_ref, e2_ref, e3_ref, e4_ref, e5_ref, e6_ref,
                    out_ref):
    D = r_ref.shape[-1]
    TB = r_ref.shape[0]

    def load_f32(ref):
        # Upcast right after load (mandatory for bf16 on v5e's no-bf16 VPU;
        # free elsewhere: the kernel is HBM-BW bound, VPU has huge slack).
        return ref[...].astype(jnp.float32)

    def lshift(v, sh):
        # torch: cat((v[:, sh:], v[:, :sh]), dim=1)  <=>  y[:, i] = v[:, (i+sh) % D]
        sh = sh % D
        if sh == 0:
            return v
        if D % 128 == 0:
            # Lane-aligned minor dim: XLU rotate (different VLIW slot from the
            # load/VALU path that dominates this bandwidth-bound kernel).
            return pltpu.roll(v, shift=D - sh, axis=1)
        # Non-128-aligned minor dim: slice + concat fallback (proven path).
        return jnp.concatenate([v[:, sh:], v[:, :sh]], axis=1)

    def sh(k):
        return int(k * D / MAX_ARITY)  # matches torch's int(k * emb_dim / 6)

    # Balanced product tree (dep depth 3 instead of a serial chain of 6).
    p0 = load_f32(r_ref) * load_f32(e1_ref)
    p1 = lshift(load_f32(e2_ref), sh(1)) * lshift(load_f32(e3_ref), sh(2))
    p2 = lshift(load_f32(e4_ref), sh(3)) * lshift(load_f32(e5_ref), sh(4))
    p3 = lshift(load_f32(e6_ref), sh(5))
    x = (p0 * p1) * (p2 * p3)

    # TODO(synk): training-mode hidden_drop (torch.nn.Dropout) not applied;
    # this reproduces eval-mode semantics (dropout == identity).

    # Lane-dense store: TB row sums along the lane axis of the (1, 1, TB) block.
    out_ref[...] = jnp.sum(x, axis=1).reshape(1, 1, TB)


# ---------------------------------------------------------------------------
# Tile selection (generation-aware VMEM budget, megacore-friendly)
# ---------------------------------------------------------------------------
def _pick_tile(B, D, itemsize, block_b=None):
    try:
        vmem = int(getattr(pltpu.get_tpu_info(), "vmem_capacity_bytes",
                           128 << 20))
    except Exception:
        vmem = 64 << 20  # conservative (v7x-sized) fallback

    # Per batch-row VMEM cost: 7 double-buffered input streams at the input
    # dtype + ~8 tile-sized f32 temporaries (upcasts / rolled copies / tree).
    per_row = 7 * 2 * D * itemsize + 8 * D * 4
    tb = (vmem // 2) // max(per_row, 1)
    tb = min(tb, 1024)                       # roofline plateaus by ~512-1024 rows

    if block_b is not None:
        tb = min(int(block_b), _round_up(B, 8))
    else:
        if B >= 16:
            # Guarantee >= 2 grid steps so ("parallel",) uses both v7x TCs.
            tb = min(tb, _round_up((B + 1) // 2, 8))
        tb = min(tb, _round_up(B, 8))

    sub = 16 if itemsize == 2 else 8         # bf16 sublane packing
    if tb >= 128:
        tb = (tb // 128) * 128               # unmasked lane-dense output stores
    else:
        tb = max(sub, (tb // sub) * sub)
    return int(tb), vmem


# ---------------------------------------------------------------------------
# Wrapper: batch-tiled, double-buffered by the BlockSpec pipeline
# ---------------------------------------------------------------------------
def hsimple_forward_pallas(r, e1, e2, e3, e4, e5, e6, *, block_b=None):
    B, D = r.shape
    itemsize = jnp.dtype(r.dtype).itemsize
    TB, vmem = _pick_tile(B, D, itemsize, block_b=block_b)
    G = pl.cdiv(B, TB)

    in_spec = pl.BlockSpec((TB, D), lambda i: (i, 0))
    out_spec = pl.BlockSpec((1, 1, TB), lambda i: (i, 0, 0))

    # Footprint: 7 double-buffered streams + ~8 f32 temporaries + tiny output.
    footprint = TB * (7 * 2 * D * itemsize + 8 * D * 4) + 2 * TB * 4
    vmem_limit = int(min(max(footprint * 5 // 4 + (4 << 20), 32 << 20),
                         vmem * 3 // 4))

    cost = pl.CostEstimate(
        flops=7 * B * D,                      # 6 muls + reduction adds per elem
        transcendentals=0,
        bytes_accessed=7 * B * D * itemsize + B * 4,
    )

    out = pl.pallas_call(
        _hsimple_kernel,
        out_shape=jax.ShapeDtypeStruct((G, 1, TB), jnp.float32),
        grid=(G,),
        in_specs=[in_spec] * 7,
        out_specs=out_spec,
        compiler_params=pltpu.CompilerParams(
            dimension_semantics=("parallel",),   # shard grid steps across TCs
            vmem_limit_bytes=vmem_limit,
        ),
        cost_estimate=cost,
    )(r, e1, e2, e3, e4, e5, e6)
    # Rows past B (partial trailing block) hold garbage sums; drop them here.
    return out.reshape(-1)[:B]


# ---------------------------------------------------------------------------
# HSimplE module (parameters + embedding-lookup glue in plain JAX)
# ---------------------------------------------------------------------------
class HSimplE:
    def __init__(self, num_ent, num_rel, emb_dim, hidden_drop=0.0, seed=0,
                 param_dtype=jnp.float32):
        self.emb_dim = emb_dim
        self.max_arity = MAX_ARITY
        self.hidden_drop_rate = hidden_drop
        self.param_dtype = param_dtype

        key = jax.random.PRNGKey(seed)
        k_e, k_r = jax.random.split(key)
        # xavier_normal_ for a (num, emb_dim) matrix: std = sqrt(2/(fan_in+fan_out))
        std_e = (2.0 / (num_ent + emb_dim)) ** 0.5
        std_r = (2.0 / (num_rel + emb_dim)) ** 0.5
        E = jax.random.normal(k_e, (num_ent, emb_dim), jnp.float32) * std_e
        E = E.at[0].set(jnp.ones((emb_dim,), jnp.float32))  # matches self.init()
        R = jax.random.normal(k_r, (num_rel, emb_dim), jnp.float32) * std_r
        # Optionally store/stream embeddings in bf16 (halves HBM traffic);
        # the kernel upcasts to f32 right after load and reduces in f32.
        self.E = E.astype(param_dtype)
        self.R = R.astype(param_dtype)

    def __call__(self, r_idx, e1_idx, e2_idx, e3_idx, e4_idx, e5_idx, e6_idx,
                 block_b=None):
        # Embedding gathers stay in XLA (see header note on why per-row DMA
        # gather fusion loses at realistic emb_dim).
        r = self.R[r_idx]
        e1 = self.E[e1_idx]
        e2 = self.E[e2_idx]
        e3 = self.E[e3_idx]
        e4 = self.E[e4_idx]
        e5 = self.E[e5_idx]
        e6 = self.E[e6_idx]
        return hsimple_forward_pallas(r, e1, e2, e3, e4, e5, e6,
                                      block_b=block_b)


# ---------------------------------------------------------------------------
# Pure-JAX reference (mirrors the torch forward exactly) for sanity checking
# ---------------------------------------------------------------------------
def _ref_forward(model, r_idx, idxs):
    D = model.emb_dim

    def shift(v, s):
        return jnp.concatenate([v[:, s:], v[:, :s]], axis=1)

    r = model.R[r_idx].astype(jnp.float32)
    es = [model.E[i].astype(jnp.float32) for i in idxs]
    x = r * es[0]
    for k in range(1, 6):
        x = x * shift(es[k], int(k * D / MAX_ARITY))
    return jnp.sum(x, axis=1)


if __name__ == "__main__":
    def run_case(emb_dim, B, num_ent, num_rel, seed, block_b=None,
                 param_dtype=jnp.float32):
        model = HSimplE(num_ent, num_rel, emb_dim, hidden_drop=0.0, seed=seed,
                        param_dtype=param_dtype)
        key = jax.random.PRNGKey(0)
        keys = jax.random.split(key, 7)
        r_idx = jax.random.randint(keys[0], (B,), 0, num_rel)
        e_idxs = [jax.random.randint(keys[i + 1], (B,), 0, num_ent)
                  for i in range(6)]
        out = model(r_idx, *e_idxs, block_b=block_b)
        out = jax.block_until_ready(out)
        ref = _ref_forward(model, r_idx, e_idxs)
        assert out.shape == (B,), out.shape
        err = float(jnp.max(jnp.abs(out - ref)))
        scale = float(jnp.max(jnp.abs(ref))) + 1e-30
        assert err <= 1e-4 * scale + 1e-30, (emb_dim, B, err, scale)

    # 1) lane-aligned emb_dim (pltpu.roll path), single block
    run_case(emb_dim=384, B=8, num_ent=50, num_rel=7, seed=0)
    # 2) non-128-aligned emb_dim (concat fallback) + partial block (B % 8 != 0,
    #    no jnp.pad anymore)
    run_case(emb_dim=96, B=13, num_ent=20, num_rel=5, seed=1)
    # 3) multi-block grid with a partial trailing block
    run_case(emb_dim=384, B=40, num_ent=50, num_rel=7, seed=2, block_b=16)
    # 4) bf16 embedding streaming (kernel upcasts to f32), auto tile choice,
    #    multi-block grid with >= 2 steps
    run_case(emb_dim=256, B=40, num_ent=64, num_rel=9, seed=3,
             param_dtype=jnp.bfloat16)

    print("KERNEL_OK")
</pallas_src>

<mosaic_0001>
module attributes {stable_mosaic.version = 11 : i64} {
  func.func @_hsimple_kernel(%arg0: i32, %arg1: memref<8x384xf32, #tpu.memory_space<vmem>>, %arg2: memref<8x384xf32, #tpu.memory_space<vmem>>, %arg3: memref<8x384xf32, #tpu.memory_space<vmem>>, %arg4: memref<8x384xf32, #tpu.memory_space<vmem>>, %arg5: memref<8x384xf32, #tpu.memory_space<vmem>>, %arg6: memref<8x384xf32, #tpu.memory_space<vmem>>, %arg7: memref<8x384xf32, #tpu.memory_space<vmem>>, %arg8: memref<1x1x8xf32, #tpu.memory_space<vmem>>) attributes {dimension_semantics = [#tpu.dimension_semantics<parallel>], iteration_bounds = array<i64: 1>, scalar_prefetch = 0 : i64, scratch_operands = 0 : i64, tpu.core_type = #tpu.core_type<tc>, window_params = [{transform_indices = @transform_0, window_bounds = array<i64: 8, 384>}, {transform_indices = @transform_1, window_bounds = array<i64: 8, 384>}, {transform_indices = @transform_2, window_bounds = array<i64: 8, 384>}, {transform_indices = @transform_3, window_bounds = array<i64: 8, 384>}, {transform_indices = @transform_4, window_bounds = array<i64: 8, 384>}, {transform_indices = @transform_5, window_bounds = array<i64: 8, 384>}, {transform_indices = @transform_6, window_bounds = array<i64: 8, 384>}, {transform_indices = @transform_7, window_bounds = array<i64: 1, 1, 8>}]} {
    %c0 = arith.constant 0 : index
    %c0_0 = arith.constant 0 : index
    %0 = vector.load %arg1[%c0, %c0_0] : memref<8x384xf32, #tpu.memory_space<vmem>>, vector<8x384xf32>
    %c0_1 = arith.constant 0 : index
    %c0_2 = arith.constant 0 : index
    %1 = vector.load %arg2[%c0_1, %c0_2] : memref<8x384xf32, #tpu.memory_space<vmem>>, vector<8x384xf32>
    %2 = arith.mulf %0, %1 : vector<8x384xf32>
    %c0_3 = arith.constant 0 : index
    %c0_4 = arith.constant 0 : index
    %3 = vector.load %arg3[%c0_3, %c0_4] : memref<8x384xf32, #tpu.memory_space<vmem>>, vector<8x384xf32>
    %c320_i32 = arith.constant 320 : i32
    %4 = tpu.dynamic_rotate %3 by %c320_i32 dim 1 : vector<8x384xf32>, i32 -> vector<8x384xf32>
    %c0_5 = arith.constant 0 : index
    %c0_6 = arith.constant 0 : index
    %5 = vector.load %arg4[%c0_5, %c0_6] : memref<8x384xf32, #tpu.memory_space<vmem>>, vector<8x384xf32>
    %c256_i32 = arith.constant 256 : i32
    %6 = tpu.dynamic_rotate %5 by %c256_i32 dim 1 : vector<8x384xf32>, i32 -> vector<8x384xf32>
    %7 = arith.mulf %4, %6 : vector<8x384xf32>
    %c0_7 = arith.constant 0 : index
    %c0_8 = arith.constant 0 : index
    %8 = vector.load %arg5[%c0_7, %c0_8] : memref<8x384xf32, #tpu.memory_space<vmem>>, vector<8x384xf32>
    %c192_i32 = arith.constant 192 : i32
    %9 = tpu.dynamic_rotate %8 by %c192_i32 dim 1 : vector<8x384xf32>, i32 -> vector<8x384xf32>
    %c0_9 = arith.constant 0 : index
    %c0_10 = arith.constant 0 : index
    %10 = vector.load %arg6[%c0_9, %c0_10] : memref<8x384xf32, #tpu.memory_space<vmem>>, vector<8x384xf32>
    %c128_i32 = arith.constant 128 : i32
    %11 = tpu.dynamic_rotate %10 by %c128_i32 dim 1 : vector<8x384xf32>, i32 -> vector<8x384xf32>
    %12 = arith.mulf %9, %11 : vector<8x384xf32>
    %c0_11 = arith.constant 0 : index
    %c0_12 = arith.constant 0 : index
    %13 = vector.load %arg7[%c0_11, %c0_12] : memref<8x384xf32, #tpu.memory_space<vmem>>, vector<8x384xf32>
    %c64_i32 = arith.constant 64 : i32
    %14 = tpu.dynamic_rotate %13 by %c64_i32 dim 1 : vector<8x384xf32>, i32 -> vector<8x384xf32>
    %15 = arith.mulf %2, %7 : vector<8x384xf32>
    %16 = arith.mulf %12, %14 : vector<8x384xf32>
    %17 = arith.mulf %15, %16 : vector<8x384xf32>
    %cst = arith.constant dense<0.000000e+00> : vector<8xf32>
    %18 = vector.multi_reduction <add>, %17, %cst [1] : vector<8x384xf32> to vector<8xf32>
    %19 = vector.shape_cast %18 : vector<8xf32> to vector<1x1x8xf32>
    %c0_13 = arith.constant 0 : index
    %c0_14 = arith.constant 0 : index
    %c0_15 = arith.constant 0 : index
    %20 = vector.load %arg8[%c0_13, %c0_14, %c0_15] : memref<1x1x8xf32, #tpu.memory_space<vmem>>, vector<1x1x8xf32>
    tpu.vector_store %arg8[%c0_13, %c0_14, %c0_15], %19 {strides = array<i32>} : memref<1x1x8xf32, #tpu.memory_space<vmem>>, vector<1x1x8xf32>,
    return
  }
  func.func @transform_0(%arg0: i32) -> (i32, i32) {
    %c0_i32 = arith.constant 0 : i32
    %c0_i32_0 = arith.constant 0 : i32
    return %arg0, %c0_i32 : i32, i32
  }
  func.func @transform_1(%arg0: i32) -> (i32, i32) {
    %c0_i32 = arith.constant 0 : i32
    %c0_i32_0 = arith.constant 0 : i32
    return %arg0, %c0_i32 : i32, i32
  }
  func.func @transform_2(%arg0: i32) -> (i32, i32) {
    %c0_i32 = arith.constant 0 : i32
    %c0_i32_0 = arith.constant 0 : i32
    return %arg0, %c0_i32 : i32, i32
  }
  func.func @transform_3(%arg0: i32) -> (i32, i32) {
    %c0_i32 = arith.constant 0 : i32
    %c0_i32_0 = arith.constant 0 : i32
    return %arg0, %c0_i32 : i32, i32
  }
  func.func @transform_4(%arg0: i32) -> (i32, i32) {
    %c0_i32 = arith.constant 0 : i32
    %c0_i32_0 = arith.constant 0 : i32
    return %arg0, %c0_i32 : i32, i32
  }
  func.func @transform_5(%arg0: i32) -> (i32, i32) {
    %c0_i32 = arith.constant 0 : i32
    %c0_i32_0 = arith.constant 0 : i32
    return %arg0, %c0_i32 : i32, i32
  }
  func.func @transform_6(%arg0: i32) -> (i32, i32) {
    %c0_i32 = arith.constant 0 : i32
    %c0_i32_0 = arith.constant 0 : i32
    return %arg0, %c0_i32 : i32, i32
  }
  func.func @transform_7(%arg0: i32) -> (i32, i32, i32) {
    %c0_i32 = arith.constant 0 : i32
    %c0_i32_0 = arith.constant 0 : i32
    %c0_i32_1 = arith.constant 0 : i32
    return %arg0, %c0_i32, %c0_i32_0 : i32, i32, i32
  }
}

</mosaic_0001>

<bundles_post_ra>
// kernel: tpu_custom_call.1
= control target key start
LH: loop header
LB: loop body
LE: loop exit
PB: predicated region body
PF: predicated region fallthrough
CT: control target
= control target key end

     0   :  { %12 = vsyncpa [#allocation3], 0  ;;  %s556_s0 = inlined_call_operand.hbm [shape: f32[8,384], index: 0, kind: input, shape index: {}]   ;;  %s557_s1 = inlined_call_operand.hbm [shape: f32[8,384], index: 1, kind: input, shape index: {}]   ;;  %s558_s2 = inlined_call_operand.hbm [shape: f32[8,384], index: 2, kind: input, shape index: {}]   ;;  %s559_s3 = inlined_call_operand.hbm [shape: f32[8,384], index: 3, kind: input, shape index: {}]   ;;  %s560_s4 = inlined_call_operand.hbm [shape: f32[8,384], index: 4, kind: input, shape index: {}]   ;;  %s561_s5 = inlined_call_operand.hbm [shape: f32[8,384], index: 5, kind: input, shape index: {}]   ;;  %s562_s6 = inlined_call_operand.hbm [shape: f32[8,384], index: 6, kind: input, shape index: {}]   ;;  %s563_s7 = inlined_call_operand.hbm [shape: f32[1,1,8], index: 7, kind: output, shape index: {}]  }
   0x1   :  { %13 = vsyncpa [#allocation6], 0 }
   0x2   :  { %14 = vsyncpa [#allocation9], 0 }
   0x3   :  { %15 = vsyncpa [#allocation12], 0 }
   0x4   :  { %16 = vsyncpa [#allocation4], 0  ;;  %s402_s24 = smov [#allocation5]   ;;  %s403_s26 = smov [#allocation8]  }
   0x5   :  { %s33_s25 = sshll.u32 %s402_s24, 4  ;;  %s53_s27 = sshll.u32 %s403_s26, 4  ;;  %s34_s25 = int_to_ptr.vmem [resolvable:$true] %s33_s25  ;;  %s54_s27 = int_to_ptr.vmem [resolvable:$true] %s53_s27 }
   0x6   :  { %s216_s30 = scalar_lea.hbm %s557_s1, 384 }
   0x7   :  { %p217_p0 = scmp.ne.s32.totalorder %s557_s1, %s216_s30  ;;  %p220_p1 = scmp.lt.u32.totalorder %s216_s30, %s557_s1 }
   0x9   :  { %p222_p2 = pnand %p220_p1, %p217_p0 }
   0xb   :  { %225 = shalt.err (!%p222_p2)
}
   0xc   :  { %s226_s12 = scalar_lea.vmem %s34_s25, 384  ;;  %p231_p4 = scmp.lt.s32.totalorder %s34_s25, %s34_s25 }
   0xd   :  { %p227_p3 = scmp.ne.s32.totalorder %s34_s25, %s226_s12  ;;  %p232_p5 = scmp.lt.s32.totalorder %s226_s12, %s226_s12 }
   0xf   :  { %p233_p6 = por %p232_p5, %p231_p4 }
  0x11   :  { %p234_p7 = pnand %p233_p6, %p227_p3 }
  0x13   :  { %237 = shalt.err (!%p234_p7)
}
  0x14   :  { %36 = dma.hbm_to_vmem [thread:$0]  %s557_s1, 384, %s34_s25, [#allocation6]  }
  0x15   :  { %s238_s17 = scalar_lea.hbm %s559_s3, 384 }
  0x16   :  { %p239_p8 = scmp.ne.s32.totalorder %s559_s3, %s238_s17  ;;  %p242_p9 = scmp.lt.u32.totalorder %s238_s17, %s559_s3 }
  0x18   :  { %p244_p10 = pnand %p242_p9, %p239_p8 }
  0x1a   :  { %247 = shalt.err (!%p244_p10)
}
  0x1b   :  { %s248_s22 = scalar_lea.vmem %s54_s27, 384  ;;  %p253_p12 = scmp.lt.s32.totalorder %s54_s27, %s54_s27 }
  0x1c   :  { %p249_p11 = scmp.ne.s32.totalorder %s54_s27, %s248_s22  ;;  %p254_p13 = scmp.lt.s32.totalorder %s248_s22, %s248_s22 }
  0x1e   :  { %p255_p0 = por %p254_p13, %p253_p12 }
  0x20   :  { %p256_p1 = pnand %p255_p0, %p249_p11 }
  0x22   :  { %259 = shalt.err (!%p256_p1)
}
  0x23   :  { %56 = dma.hbm_to_vmem [thread:$0]  %s559_s3, 384, %s54_s27, [#allocation9]  }
  0x24   :  { %s404_s24 = smov [#allocation11]   ;;  %s405_s26 = smov [#allocation2]  }
  0x25   :  { %s73_s25 = sshll.u32 %s404_s24, 4  ;;  %s23_s28 = sshll.u32 %s405_s26, 4  ;;  %s74_s25 = int_to_ptr.vmem [resolvable:$true] %s73_s25  ;;  %s24_s28 = int_to_ptr.vmem [resolvable:$true] %s23_s28 }
  0x26   :  { %s260_s8 = scalar_lea.hbm %s561_s5, 384 }
  0x27   :  { %p261_p2 = scmp.ne.s32.totalorder %s561_s5, %s260_s8  ;;  %p264_p3 = scmp.lt.u32.totalorder %s260_s8, %s561_s5 }
  0x29   :  { %p266_p4 = pnand %p264_p3, %p261_p2 }
  0x2b   :  { %269 = shalt.err (!%p266_p4)
}
  0x2c   :  { %s270_s3 = scalar_lea.vmem %s74_s25, 384  ;;  %p275_p6 = scmp.lt.s32.totalorder %s74_s25, %s74_s25 }
  0x2d   :  { %p271_p5 = scmp.ne.s32.totalorder %s74_s25, %s270_s3  ;;  %p276_p7 = scmp.lt.s32.totalorder %s270_s3, %s270_s3 }
  0x2f   :  { %p277_p8 = por %p276_p7, %p275_p6 }
  0x31   :  { %p278_p9 = pnand %p277_p8, %p271_p5 }
  0x33   :  { %281 = shalt.err (!%p278_p9)
}
  0x34   :  { %76 = dma.hbm_to_vmem [thread:$0]  %s561_s5, 384, %s74_s25, [#allocation12]  }
  0x35   :  { %s282_s16 = scalar_lea.hbm %s556_s0, 384 }
  0x36   :  { %p283_p10 = scmp.ne.s32.totalorder %s556_s0, %s282_s16  ;;  %p286_p11 = scmp.lt.u32.totalorder %s282_s16, %s556_s0 }
  0x38   :  { %p288_p12 = pnand %p286_p11, %p283_p10 }
  0x3a   :  { %291 = shalt.err (!%p288_p12)
}
  0x3b   :  { %s292_s21 = scalar_lea.vmem %s24_s28, 384  ;;  %p297_p0 = scmp.lt.s32.totalorder %s24_s28, %s24_s28 }
  0x3c   :  { %p293_p13 = scmp.ne.s32.totalorder %s24_s28, %s292_s21  ;;  %p298_p1 = scmp.lt.s32.totalorder %s292_s21, %s292_s21 }
  0x3e   :  { %p299_p2 = por %p298_p1, %p297_p0 }
  0x40   :  { %p300_p3 = pnand %p299_p2, %p293_p13 }
  0x42   :  { %303 = shalt.err (!%p300_p3)
}
  0x43   :  { %26 = dma.hbm_to_vmem [thread:$0]  %s556_s0, 384, %s24_s28, [#allocation3]  }
  0x44   :  { %s406_s1 = smov [#allocation7]   ;;  %s407_s24 = smov [#allocation10]  }
  0x45   :  { %s43_s23 = sshll.u32 %s406_s1, 4  ;;  %s63_s25 = sshll.u32 %s407_s24, 4  ;;  %s44_s23 = int_to_ptr.vmem [resolvable:$true] %s43_s23  ;;  %s64_s25 = int_to_ptr.vmem [resolvable:$true] %s63_s25 }
  0x46   :  { %s304_s30 = scalar_lea.hbm %s558_s2, 384 }
  0x47   :  { %p305_p4 = scmp.ne.s32.totalorder %s558_s2, %s304_s30  ;;  %p308_p5 = scmp.lt.u32.totalorder %s304_s30, %s558_s2 }
  0x49   :  { %p310_p6 = pnand %p308_p5, %p305_p4 }
  0x4b   :  { %313 = shalt.err (!%p310_p6)
}
  0x4c   :  { %s314_s0 = scalar_lea.vmem %s44_s23, 384  ;;  %p319_p8 = scmp.lt.s32.totalorder %s44_s23, %s44_s23 }
  0x4d   :  { %p315_p7 = scmp.ne.s32.totalorder %s44_s23, %s314_s0  ;;  %p320_p9 = scmp.lt.s32.totalorder %s314_s0, %s314_s0 }
  0x4f   :  { %p321_p10 = por %p320_p9, %p319_p8 }
  0x51   :  { %p322_p11 = pnand %p321_p10, %p315_p7 }
  0x53   :  { %325 = shalt.err (!%p322_p11)
}
  0x54   :  { %46 = dma.hbm_to_vmem [thread:$0]  %s558_s2, 384, %s44_s23, [#allocation6]  }
  0x55   :  { %s326_s13 = scalar_lea.hbm %s560_s4, 384 }
  0x56   :  { %p327_p12 = scmp.ne.s32.totalorder %s560_s4, %s326_s13  ;;  %p330_p13 = scmp.lt.u32.totalorder %s326_s13, %s560_s4 }
  0x58   :  { %p332_p0 = pnand %p330_p13, %p327_p12 }
  0x5a   :  { %335 = shalt.err (!%p332_p0)
}
  0x5b   :  { %s336_s18 = scalar_lea.vmem %s64_s25, 384  ;;  %p341_p2 = scmp.lt.s32.totalorder %s64_s25, %s64_s25 }
  0x5c   :  { %p337_p1 = scmp.ne.s32.totalorder %s64_s25, %s336_s18  ;;  %p342_p3 = scmp.lt.s32.totalorder %s336_s18, %s336_s18 }
  0x5e   :  { %p343_p4 = por %p342_p3, %p341_p2 }
  0x60   :  { %p344_p5 = pnand %p343_p4, %p337_p1 }
  0x62   :  { %347 = shalt.err (!%p344_p5)
}
  0x63   :  { %66 = dma.hbm_to_vmem [thread:$0]  %s560_s4, 384, %s64_s25, [#allocation9]  }
  0x64   :  { %s408_s20 = smov [#allocation13]   ;;  %s348_s1 = scalar_lea.hbm %s562_s6, 384 }
  0x65   :  { %s83_s21 = sshll.u32 %s408_s20, 4  ;;  %p349_p6 = scmp.ne.s32.totalorder %s562_s6, %s348_s1  ;;  %s84_s21 = int_to_ptr.vmem [resolvable:$true] %s83_s21 }
  0x66   :  { %p352_p7 = scmp.lt.u32.totalorder %s348_s1, %s562_s6 }
  0x68   :  { %p354_p8 = pnand %p352_p7, %p349_p6 }
  0x6a   :  { %357 = shalt.err (!%p354_p8)
}
  0x6b   :  { %s358_s30 = scalar_lea.vmem %s84_s21, 384  ;;  %p363_p10 = scmp.lt.s32.totalorder %s84_s21, %s84_s21 }
  0x6c   :  { %p359_p9 = scmp.ne.s32.totalorder %s84_s21, %s358_s30  ;;  %p364_p11 = scmp.lt.s32.totalorder %s358_s30, %s358_s30 }
  0x6e   :  { %p365_p12 = por %p364_p11, %p363_p10 }
  0x70   :  { %p366_p13 = pnand %p365_p12, %p359_p9 }
  0x72   :  { %369 = shalt.err (!%p366_p13)
}
  0x73   :  { %86 = dma.hbm_to_vmem [thread:$0]  %s562_s6, 384, %s84_s21, [#allocation12]  }
  0x74   :  { %392 = dma.done.wait [#allocation3], 384  }
  0x75   :  { %393 = vsyncadd [#allocation3], 4294966912 }
  0x76   :  { %394 = dma.done.wait [#allocation6], 768  }
  0x77   :  { %395 = vsyncadd [#allocation6], 4294966528 }
  0x78   :  { %396 = dma.done.wait [#allocation9], 768  }
  0x79   :  { %397 = vsyncadd [#allocation9], 4294966528 }
  0x7a   :  { %398 = dma.done.wait [#allocation12], 768  }
  0x7b   :  { %399 = vsyncadd [#allocation12], 4294966528  ;;  %v119_v0 = vld [vmem:[#allocation7 + $0x10] sm:$0xff]  ;;  %v117_v1 = vld [vmem:[#allocation7] sm:$0xff]  ;;  %s409_s8 = smov 64   ;;  %v126_v6 = vlaneseq  ;;  %s410_s6 = smov [#allocation14]  }
  0x7c   :  { %124 = vrot.lane.b32.xlu1 %v119_v0, %s409_s8  ;;  %120 = vrot.lane.b32.xlu0 %v117_v1, %s409_s8  ;;  %v138_v2 = vld [vmem:[#allocation10] sm:$0xff]  ;;  %v118_v3 = vld [vmem:[#allocation7 + $0x8] sm:$0xff]  ;;  %v140_v4 = vld [vmem:[#allocation10 + $0x10] sm:$0xff]  ;;  %s195_s9 = sshll.u32 %s410_s6, 4  ;;  %vm187_vm1 = vcmask 57344   ;;  %s196_s9 = int_to_ptr.vmem [resolvable:$true] %s195_s9 }
  0x7d   :  { %v139_v5 = vld [vmem:[#allocation10 + $0x8] sm:$0xff]  ;;  %v157_v7 = vld [vmem:[#allocation13 + $0x8] sm:$0xff]  ;;  %v156_v8 = vld [vmem:[#allocation13] sm:$0xff]  ;;  %v127_v9 = vand.u32 127, %v126_v6  ;;  %v183_v10 = vshrl.u32 %v126_v6, 7  ;;  %s370_s10 = scalar_lea.vmem %s196_s9, 16  ;;  %p375_p1 = scmp.lt.s32.totalorder %s196_s9, %s196_s9 }
  0x7e   :  { %v158_v11 = vld [vmem:[#allocation13 + $0x10] sm:$0xff]  ;;  %v111_v20 = vld [vmem:[#allocation5] sm:$0xff]  ;;  %v133_v21 = vld [vmem:[#allocation8 + $0x8] sm:$0xff]  ;;  %p371_p0 = scmp.ne.s32.totalorder %s196_s9, %s370_s10  ;;  %s374_s11 = scalar_lea.vmem %s196_s9, 32 }
  0x7f   :  { %v184_v12 = vsub.s32 %v127_v9, %v183_v10  ;;  %v108_v19 = vld [vmem:[#allocation2] sm:$0xff]  ;;  %vm128_vm0 = vcmp.lt.s32.totalorder %v127_v9, 64  ;;  %v134_v22 = vld [vmem:[#allocation8 + $0x10] sm:$0xff]  ;;  %v109_v23 = vld [vmem:[#allocation2 + $0x8] sm:$0xff]  ;;  %p376_p2 = scmp.lt.s32.totalorder %s374_s11, %s370_s10 }
  0x80   :  { %141 = vrot.lane.b32.xlu1 %v138_v2, %s409_s8  ;;  %122 = vrot.lane.b32.xlu0 %v118_v3, %s409_s8  ;;  %v112_v24 = vld [vmem:[#allocation5 + $0x8] sm:$0xff]  ;;  %v150_v27 = vld [vmem:[#allocation11] sm:$0xff]  ;;  %v110_v29 = vld [vmem:[#allocation2 + $0x10] sm:$0xff]  ;;  %v114_v31 = vmul.f32 %v111_v20, %v108_v19 }
  0x81   :  { %v113_v30 = vld [vmem:[#allocation5 + $0x10] sm:$0xff]  ;;  %v151_v36 = vld [vmem:[#allocation11 + $0x8] sm:$0xff]  ;;  %v115_v41 = vmul.f32 %v112_v24, %v109_v23  ;;  %p377_p3 = por %p376_p2, %p375_p1 }
  0x82   :  { %v132_v34 = vld [vmem:[#allocation8] sm:$0xff]  ;;  %v116_v45 = vmul.f32 %v113_v30, %v110_v29 }
  0x83   :  { %v152_v37 = vld [vmem:[#allocation11 + $0x10] sm:$0xff]  ;;  %p378_p4 = pnand %p377_p3, %p371_p0 }
  0x84   :  { %145 = vrot.lane.b32.xlu1 %v140_v4, %s409_s8  ;;  %143 = vrot.lane.b32.xlu0 %v139_v5, %s409_s8 }
  0x88   :  { %161 = vrot.lane.b32.xlu1 %v157_v7, %s409_s8  ;;  %159 = vrot.lane.b32.xlu0 %v156_v8, %s409_s8 }
  0x8c   :  { %163 = vrot.lane.b32.xlu0 %v158_v11, %s409_s8 }
  0xee   :  { %v125_v13 = vpop.permute.xlu1 %124  ;;  %v121_v14 = vpop.permute.xlu0 %120 }
  0xef   :  { %v131_v35 = vsel %vm128_vm0, %v125_v13, %v121_v14 }
  0xf0   :  { %v137_v46 = vmul.f32 %v132_v34, %v131_v35 }
  0xf2   :  { %v142_v15 = vpop.permute.xlu1 %141  ;;  %v123_v16 = vpop.permute.xlu0 %122  ;;  %v170_v57 = vmul.f32 %v137_v46, %v116_v45 }
  0xf3   :  { %v129_v25 = vsel %vm128_vm0, %v123_v16, %v125_v13  ;;  %v130_v26 = vsel %vm128_vm0, %v121_v14, %v123_v16 }
  0xf4   :  { %v135_v42 = vmul.f32 %v133_v21, %v130_v26  ;;  %v136_v43 = vmul.f32 %v134_v22, %v129_v25 }
  0xf6   :  { %v146_v17 = vpop.permute.xlu1 %145  ;;  %v144_v18 = vpop.permute.xlu0 %143  ;;  %v168_v53 = vmul.f32 %v135_v42, %v114_v31  ;;  %v169_v54 = vmul.f32 %v136_v43, %v115_v41 }
  0xf7   :  { %v149_v28 = vsel %vm128_vm0, %v146_v17, %v142_v15  ;;  %v147_v38 = vsel %vm128_vm0, %v144_v18, %v146_v17  ;;  %v148_v39 = vsel %vm128_vm0, %v142_v15, %v144_v18 }
  0xf8   :  { %v154_v44 = vmul.f32 %v150_v27, %v149_v28  ;;  %v153_v47 = vmul.f32 %v152_v37, %v147_v38  ;;  %v155_v48 = vmul.f32 %v151_v36, %v148_v39 }
  0xfa   :  { %v162_v32 = vpop.permute.xlu1 %161  ;;  %v160_v33 = vpop.permute.xlu0 %159 }
  0xfb   :  { %v166_v40 = vsel %vm128_vm0, %v160_v33, %v162_v32 }
  0xfc   :  { %v172_v49 = vmul.f32 %v166_v40, %v154_v44 }
  0xfe   :  { %v164_v50 = vpop.permute.xlu0 %163  ;;  %v175_v58 = vmul.f32 %v172_v49, %v169_v54 }
  0xff   :  { %v165_v51 = vsel %vm128_vm0, %v162_v32, %v164_v50  ;;  %v167_v52 = vsel %vm128_vm0, %v164_v50, %v160_v33 }
 0x100   :  { %v171_v55 = vmul.f32 %v167_v52, %v153_v47  ;;  %v173_v56 = vmul.f32 %v165_v51, %v155_v48 }
 0x102   :  { %v174_v59 = vmul.f32 %v171_v55, %v168_v53  ;;  %v176_v60 = vmul.f32 %v173_v56, %v170_v57 }
 0x104   :  { %v177_v61 = vadd.f32 %v175_v58, %v174_v59 }
 0x106   :  { %v178_v62 = vadd.f32 %v177_v61, %v176_v60 }
 0x108   :  { %179 = vadd.xlane.f32.xlu1 %v178_v62 }
 0x195   :  { %v180_v63 = vpop.xlane.xlu1 %179 }
 0x196   :  { %v185_v0 = vrot.slane %v180_v63, %v184_v12 }
 0x198   :  { %188 = vst.msk [vmem:[#allocation14] sm:$0x1] %vm187_vm1, %v185_v0 }
 0x199   :  { %381 = shalt.err (!%p378_p4)
}
 0x19a   :  { %s382_s12 = scalar_lea.hbm %s563_s7, 16 }
 0x19b   :  { %p383_p5 = scmp.ne.s32.totalorder %s563_s7, %s382_s12  ;;  %p386_p6 = scmp.lt.u32.totalorder %s382_s12, %s563_s7 }
 0x19d   :  { %p388_p7 = pnand %p386_p6, %p383_p5 }
 0x19f   :  { %391 = shalt.err (!%p388_p7)
}
 0x1a0   :  { %198 = dma.vmem_to_hbm [thread:$0]  %s196_s9, 16, %s563_s7, [#allocation4]  }
 0x1a1   :  { %400 = dma.done.wait [#allocation4], 16  }
 0x1a2   :  { %401 = vsyncadd [#allocation4], 4294967280 }
 0x1a3   :  { %202 = vsyncpa [#allocation3], 1 }
 0x1a4   :  { %203 = vsyncpa [#allocation6], 1 }
 0x1a5   :  { %204 = vsyncpa [#allocation9], 1 }
 0x1a6   :  { %205 = vsyncpa [#allocation12], 1 }
 0x1a7   :  { %206 = vsyncpa [#allocation4], 1 }

</bundles_post_ra>
